<compile_context>
chip_gen: v6e
topology: v6e:2x2x1
jax: 0.10.0
libtpu: 0.0.40
codegen_flags: <defaults>
</compile_context>

<pallas_src>
import functools

import jax
import jax.numpy as jnp
from jax.experimental import pallas as pl
from jax.experimental.pallas import tpu as pltpu


def _round_up(n, m):
    return ((n + m - 1) // m) * m


def _physical_vmem_bytes():
    try:
        info = pltpu.get_tpu_info()
        v = getattr(info, "vmem_capacity_bytes", None)
        if v:
            return int(v)
    except Exception:
        pass
    return 64 * 1024 * 1024  # conservative: v7x per-TensorCore VMEM


def _clamp_vmem(requested, phys):
    cap = max(int(phys * 0.75), 16 * 1024 * 1024)  # leave headroom on v7x
    return int(min(max(int(requested), 16 * 1024 * 1024), cap))


def _pick_tile(n_pad, desired):
    """Largest multiple of 128 that divides n_pad and is <= desired."""
    desired = max(128, min(desired, n_pad))
    units = n_pad // 128
    for u in range(min(desired // 128, units), 0, -1):
        if units % u == 0:
            return u * 128
    return 128


# ----------------------------------------------------------------------------
# Fused single-call kernel (A VMEM-resident, read from HBM once).
# ----------------------------------------------------------------------------
def _vgcn_fused_kernel(a_ref, xw1_ref, b1_ref, wc_ref, bc_ref, o_ref):
    a = a_ref[...]
    h = jnp.maximum(
        jnp.dot(a, xw1_ref[...], preferred_element_type=jnp.float32)
        + b1_ref[...], 0.0)
    hw = jnp.dot(h, wc_ref[...], preferred_element_type=jnp.float32)
    hw = hw.astype(jnp.bfloat16)
    o_ref[...] = (jnp.dot(a, hw, preferred_element_type=jnp.float32)
                  + bc_ref[...])


def _vgcn_fused(a_bf16, xw1_bf16, b1, wc, bc, *, vmem_limit):
    n_pad = a_bf16.shape[0]
    c1 = xw1_bf16.shape[1]
    c2 = wc.shape[1]
    return pl.pallas_call(
        _vgcn_fused_kernel,
        out_shape=jax.ShapeDtypeStruct((n_pad, c2), jnp.float32),
        grid_spec=pltpu.PrefetchScalarGridSpec(
            num_scalar_prefetch=0,
            grid=(1,),
            in_specs=[
                pl.BlockSpec((n_pad, n_pad), lambda i: (0, 0)),  # A (resident)
                pl.BlockSpec((n_pad, c1), lambda i: (0, 0)),     # x @ W1 (bf16)
                pl.BlockSpec((1, c1), lambda i: (0, 0)),         # b1
                pl.BlockSpec((c1, c2), lambda i: (0, 0)),        # W_mu|W_ls
                pl.BlockSpec((1, c2), lambda i: (0, 0)),         # b_mu|b_ls
            ],
            out_specs=pl.BlockSpec((n_pad, c2), lambda i: (0, 0)),
        ),
        compiler_params=pltpu.CompilerParams(
            dimension_semantics=("arbitrary",),
            vmem_limit_bytes=vmem_limit,
        ),
    )(a_bf16, xw1_bf16, b1, wc, bc)


# ----------------------------------------------------------------------------
# Tiled pass 1:  hw = ((relu(A @ XW1 + b1)) @ W_cat).astype(bf16)
#   grid = (row tiles, k tiles); XW1 / W_cat VMEM-resident full blocks.
# ----------------------------------------------------------------------------
def _gcn_layer1_kernel(a_ref, m_ref, b1_ref, wc_ref, hw_ref, acc_ref, *, tk):
    k = pl.program_id(1)

    @pl.when(k == 0)
    def _():
        acc_ref[...] = jnp.zeros_like(acc_ref)

    ks = pl.multiple_of(k * tk, tk)
    acc_ref[...] += jnp.dot(a_ref[...], m_ref[pl.ds(ks, tk), :],
                            preferred_element_type=jnp.float32)

    @pl.when(k == pl.num_programs(1) - 1)
    def _():
        h = jnp.maximum(acc_ref[...] + b1_ref[...], 0.0)
        hw = jnp.dot(h, wc_ref[...], preferred_element_type=jnp.float32)
        hw_ref[...] = hw.astype(hw_ref.dtype)


def _gcn_layer1(a_bf16, xw1_bf16, b1, wc, *, tm, tk, vmem_limit):
    n_pad = a_bf16.shape[0]
    c1 = xw1_bf16.shape[1]
    c2 = wc.shape[1]
    grid = (n_pad // tm, n_pad // tk)
    kernel = functools.partial(_gcn_layer1_kernel, tk=tk)
    return pl.pallas_call(
        kernel,
        out_shape=jax.ShapeDtypeStruct((n_pad, c2), jnp.bfloat16),
        grid_spec=pltpu.PrefetchScalarGridSpec(
            num_scalar_prefetch=0,
            grid=grid,
            in_specs=[
                pl.BlockSpec((tm, tk), lambda i, k: (i, k)),      # A tile
                pl.BlockSpec((n_pad, c1), lambda i, k: (0, 0)),   # XW1 (resident)
                pl.BlockSpec((1, c1), lambda i, k: (0, 0)),       # b1
                pl.BlockSpec((c1, c2), lambda i, k: (0, 0)),      # W_cat
            ],
            out_specs=pl.BlockSpec((tm, c2), lambda i, k: (i, 0)),
            scratch_shapes=[pltpu.VMEM((tm, c1), jnp.float32)],
        ),
        compiler_params=pltpu.CompilerParams(
            dimension_semantics=("parallel", "arbitrary"),
            vmem_limit_bytes=vmem_limit,
        ),
    )(a_bf16, xw1_bf16, b1, wc)


# ----------------------------------------------------------------------------
# Tiled pass 2:  Y = A @ HW + b_cat   (f32 output, accumulate into o_ref)
# ----------------------------------------------------------------------------
def _gcn_agg_kernel(a_ref, m_ref, b_ref, o_ref, *, tk):
    k = pl.program_id(1)

    @pl.when(k == 0)
    def _():
        o_ref[...] = jnp.zeros_like(o_ref)

    ks = pl.multiple_of(k * tk, tk)
    o_ref[...] += jnp.dot(a_ref[...], m_ref[pl.ds(ks, tk), :],
                          preferred_element_type=jnp.float32)

    @pl.when(k == pl.num_programs(1) - 1)
    def _():
        o_ref[...] = o_ref[...] + b_ref[...]


def _gcn_agg(a_bf16, hw_bf16, bc, *, tm, tk, vmem_limit):
    n_pad = a_bf16.shape[0]
    c2 = hw_bf16.shape[1]
    grid = (n_pad // tm, n_pad // tk)
    kernel = functools.partial(_gcn_agg_kernel, tk=tk)
    return pl.pallas_call(
        kernel,
        out_shape=jax.ShapeDtypeStruct((n_pad, c2), jnp.float32),
        grid_spec=pltpu.PrefetchScalarGridSpec(
            num_scalar_prefetch=0,
            grid=grid,
            in_specs=[
                pl.BlockSpec((tm, tk), lambda i, k: (i, k)),      # A tile
                pl.BlockSpec((n_pad, c2), lambda i, k: (0, 0)),   # HW (resident)
                pl.BlockSpec((1, c2), lambda i, k: (0, 0)),       # b_cat
            ],
            out_specs=pl.BlockSpec((tm, c2), lambda i, k: (i, 0)),
        ),
        compiler_params=pltpu.CompilerParams(
            dimension_semantics=("parallel", "arbitrary"),
            vmem_limit_bytes=vmem_limit,
        ),
    )(a_bf16, hw_bf16, bc)


# ----------------------------------------------------------------------------
# Encoder forward.
# ----------------------------------------------------------------------------
def vgcn_encoder_pallas(a_hat, x, params, *, tm=512, tk=1024, force_tiled=False):
    n = x.shape[0]
    in_ch = x.shape[1]
    hid = params["w1"].shape[1]          # 2 * out_channels
    out_ch = params["wmu"].shape[1]

    n_pad = _round_up(n, 128)            # minimal 128-padding only
    c1 = _round_up(hid, 128)             # lane-dense hidden width
    c2 = _round_up(2 * out_ch, 128)      # lane-dense fused mu|logstd width

    # Padded bf16 adjacency built directly (no padded f32 temporary).
    a_bf16 = jnp.zeros((n_pad, n_pad), jnp.bfloat16).at[:n, :n].set(
        a_hat.astype(jnp.bfloat16))

    # Lane-pad weights / biases to 128-wide slabs (zero columns stay zero
    # through relu and aggregation; sliced off at the end).
    w1 = jnp.zeros((in_ch, c1), jnp.float32).at[:, :hid].set(params["w1"])
    b1 = jnp.zeros((1, c1), jnp.float32).at[:, :hid].set(params["b1"])
    w_cat = jnp.concatenate([params["wmu"], params["wls"]], axis=1)
    b_cat = jnp.concatenate([params["bmu"], params["bls"]], axis=1)
    wc = jnp.zeros((c1, c2), jnp.float32).at[:hid, :2 * out_ch].set(w_cat)
    bc = jnp.zeros((1, c2), jnp.float32).at[:, :2 * out_ch].set(b_cat)

    # Tiny, MXU-unfriendly feature matmul hoisted off the A stream.
    x_pad = jnp.zeros((n_pad, in_ch), jnp.float32).at[:n, :].set(x)
    xw1 = (x_pad @ w1).astype(jnp.bfloat16)                    # (n_pad, c1)

    phys = _physical_vmem_bytes()

    # Fused path if A (double-buffered bf16) + small operands fit comfortably.
    fused_req = (2 * n_pad * n_pad * 2 + 2 * n_pad * c1 * 2
                 + 2 * n_pad * c2 * 4 + n_pad * (c1 + c2) * 4
                 + 4 * c1 * c2 + 8 * (c1 + c2))
    use_fused = (not force_tiled) and fused_req <= int(0.6 * phys)

    if use_fused:
        y = _vgcn_fused(a_bf16, xw1, b1, wc, bc,
                        vmem_limit=_clamp_vmem(fused_req * 1.3, phys))
    else:
        # Tile selection: >= 2 row tiles when possible (v7x megacore), biggest
        # 128-multiple divisors of n_pad otherwise.
        tm_desired = min(tm, n_pad // 2) if n_pad >= 256 else tm
        tm_eff = _pick_tile(n_pad, tm_desired)
        tk_eff = _pick_tile(n_pad, tk)

        req1 = (2 * tm_eff * tk_eff * 2 + 2 * n_pad * c1 * 2
                + 2 * c1 * c2 * 4 + 2 * tm_eff * c2 * 2 + tm_eff * c1 * 4)
        hw = _gcn_layer1(a_bf16, xw1, b1, wc, tm=tm_eff, tk=tk_eff,
                         vmem_limit=_clamp_vmem(req1 * 1.5, phys))

        req2 = (2 * tm_eff * tk_eff * 2 + 2 * n_pad * c2 * 2
                + 2 * tm_eff * c2 * 4 + 2 * c2 * 4)
        y = _gcn_agg(a_bf16, hw, bc, tm=tm_eff, tk=tk_eff,
                     vmem_limit=_clamp_vmem(req2 * 1.5, phys))

    mu = y[:n, :out_ch]
    logstd = y[:n, out_ch:2 * out_ch]
    return mu, logstd


# ----------------------------------------------------------------------------
# Glue (plain JAX): normalized adjacency, weight init, references.
# ----------------------------------------------------------------------------
def gcn_norm_adj(edge_index, num_nodes):
    """Dense A_hat = D^-1/2 (A + I) D^-1/2, matching GCNConv defaults
    (self-loops in edge_index are replaced, not double-counted)."""
    src, dst = edge_index
    adj = jnp.zeros((num_nodes, num_nodes), jnp.float32).at[src, dst].set(1.0)
    eye = jnp.eye(num_nodes, dtype=jnp.float32)
    adj = jnp.where(eye > 0, 1.0, adj)
    deg = adj.sum(axis=1)
    dinv = jnp.where(deg > 0, 1.0 / jnp.sqrt(deg), 0.0)
    return adj * dinv[:, None] * dinv[None, :]


def init_params(key, in_channels, out_channels):
    hid = 2 * out_channels
    k1, k2, k3 = jax.random.split(key, 3)

    def glorot(k, shape):
        fan_in, fan_out = shape
        lim = jnp.sqrt(6.0 / (fan_in + fan_out))
        return jax.random.uniform(k, shape, jnp.float32, -lim, lim)

    return {
        "w1":  glorot(k1, (in_channels, hid)),
        "b1":  jnp.zeros((1, hid), jnp.float32),
        "wmu": glorot(k2, (hid, out_channels)),
        "bmu": jnp.zeros((1, out_channels), jnp.float32),
        "wls": glorot(k3, (hid, out_channels)),
        "bls": jnp.zeros((1, out_channels), jnp.float32),
    }


def reference_forward_f32(a_hat, x, p):
    h = jnp.maximum(a_hat @ (x @ p["w1"]) + p["b1"], 0.0)
    mu = a_hat @ (h @ p["wmu"]) + p["bmu"]
    ls = a_hat @ (h @ p["wls"]) + p["bls"]
    return mu, ls


def reference_forward_pipeline(a_hat, x, p):
    """Same dtype pipeline as the kernels (bf16 operands, f32 accumulation)."""
    a = a_hat.astype(jnp.bfloat16)
    out_ch = p["wmu"].shape[1]
    xw1 = (x @ p["w1"]).astype(jnp.bfloat16)
    h = jnp.maximum(
        jnp.dot(a, xw1, preferred_element_type=jnp.float32) + p["b1"], 0.0)
    w_cat = jnp.concatenate([p["wmu"], p["wls"]], axis=1)
    b_cat = jnp.concatenate([p["bmu"], p["bls"]], axis=1)
    hw = jnp.dot(h, w_cat,
                 preferred_element_type=jnp.float32).astype(jnp.bfloat16)
    y = jnp.dot(a, hw, preferred_element_type=jnp.float32) + b_cat
    return y[:, :out_ch], y[:, out_ch:]


if __name__ == "__main__":
    key = jax.random.PRNGKey(0)
    k_x, k_p = jax.random.split(key)

    num_nodes = 256
    in_channels = 8
    out_channels = 32  # hidden = 2 * out = 64 (padded to 128 lanes internally)

    x = jax.random.normal(k_x, (num_nodes, in_channels), jnp.float32)

    # deterministic undirected ring graph edge_index (2, 2*N)
    idx = jnp.arange(num_nodes)
    nxt = (idx + 1) % num_nodes
    src = jnp.concatenate([idx, nxt])
    dst = jnp.concatenate([nxt, idx])
    edge_index = jnp.stack([src, dst])
    # TODO(synk): for genuinely large sparse graphs, a block-sparse / gather
    # formulation via PrefetchScalarGridSpec would avoid the dense (N,N) A_hat.

    a_hat = gcn_norm_adj(edge_index, num_nodes)
    params = init_params(k_p, in_channels, out_channels)

    # Fused single-pass path (A VMEM-resident; auto-selected at this size).
    mu, logstd = vgcn_encoder_pallas(a_hat, x, params)
    jax.block_until_ready((mu, logstd))

    # Also exercise the tiled streaming path used for large graphs.
    mu_t, ls_t = vgcn_encoder_pallas(a_hat, x, params, force_tiled=True)
    jax.block_until_ready((mu_t, ls_t))

    assert mu.shape == (num_nodes, out_channels)
    assert logstd.shape == (num_nodes, out_channels)
    assert mu_t.shape == (num_nodes, out_channels)
    assert ls_t.shape == (num_nodes, out_channels)

    # exact-semantics check vs a reference with the same bf16/f32 pipeline
    mu_r, ls_r = reference_forward_pipeline(a_hat, x, params)
    for got_mu, got_ls in ((mu, logstd), (mu_t, ls_t)):
        assert jnp.allclose(got_mu, mu_r, atol=1e-2, rtol=1e-2)
        assert jnp.allclose(got_ls, ls_r, atol=1e-2, rtol=1e-2)

    # sanity check vs the full-f32 reference (bf16 operand rounding tolerance)
    mu_f, ls_f = reference_forward_f32(a_hat, x, params)
    assert jnp.allclose(mu, mu_f, atol=5e-2, rtol=5e-2)
    assert jnp.allclose(logstd, ls_f, atol=5e-2, rtol=5e-2)

    print("KERNEL_OK")
</pallas_src>

<mosaic_0001>
module attributes {stable_mosaic.version = 11 : i64} {
  func.func @_vgcn_fused_kernel(%arg0: i32, %arg1: memref<256x256xbf16, #tpu.memory_space<vmem>>, %arg2: memref<256x128xbf16, #tpu.memory_space<vmem>>, %arg3: memref<1x128xf32, #tpu.memory_space<vmem>>, %arg4: memref<128x128xf32, #tpu.memory_space<vmem>>, %arg5: memref<1x128xf32, #tpu.memory_space<vmem>>, %arg6: memref<256x128xf32, #tpu.memory_space<vmem>>) attributes {dimension_semantics = [#tpu.dimension_semantics<arbitrary>], iteration_bounds = array<i64: 1>, scalar_prefetch = 0 : i64, scratch_operands = 0 : i64, tpu.core_type = #tpu.core_type<tc>, window_params = [{pipeline_mode = #tpu.pipeline_mode<synchronous>, transform_indices = @transform_0, window_bounds = array<i64: 256, 256>}, {pipeline_mode = #tpu.pipeline_mode<synchronous>, transform_indices = @transform_1, window_bounds = array<i64: 256, 128>}, {pipeline_mode = #tpu.pipeline_mode<synchronous>, transform_indices = @transform_2, window_bounds = array<i64: 1, 128>}, {pipeline_mode = #tpu.pipeline_mode<synchronous>, transform_indices = @transform_3, window_bounds = array<i64: 128, 128>}, {pipeline_mode = #tpu.pipeline_mode<synchronous>, transform_indices = @transform_4, window_bounds = array<i64: 1, 128>}, {pipeline_mode = #tpu.pipeline_mode<synchronous>, transform_indices = @transform_5, window_bounds = array<i64: 256, 128>}]} {
    %c0 = arith.constant 0 : index
    %c0_0 = arith.constant 0 : index
    %0 = vector.load %arg1[%c0, %c0_0] : memref<256x256xbf16, #tpu.memory_space<vmem>>, vector<256x256xbf16>
    %c0_1 = arith.constant 0 : index
    %c0_2 = arith.constant 0 : index
    %1 = vector.load %arg2[%c0_1, %c0_2] : memref<256x128xbf16, #tpu.memory_space<vmem>>, vector<256x128xbf16>
    %cst = arith.constant dense<0.000000e+00> : vector<256x128xf32>
    %2 = tpu.matmul %0, %1, %cst {dimension_numbers = #tpu.dot_dimension_numbers<[1], [0], [0], [1], [0, 0, 1, 1], [], []>} : vector<256x256xbf16>, vector<256x128xbf16>, vector<256x128xf32> -> vector<256x128xf32>
    %c0_3 = arith.constant 0 : index
    %c0_4 = arith.constant 0 : index
    %3 = vector.load %arg3[%c0_3, %c0_4] : memref<1x128xf32, #tpu.memory_space<vmem>>, vector<1x128xf32>
    %4 = vector.broadcast %3 : vector<1x128xf32> to vector<256x128xf32>
    %5 = arith.addf %2, %4 : vector<256x128xf32>
    %cst_5 = arith.constant 0.000000e+00 : f32
    %6 = vector.broadcast %cst_5 : f32 to vector<256x128xf32>
    %7 = arith.maximumf %5, %6 : vector<256x128xf32>
    %c0_6 = arith.constant 0 : index
    %c0_7 = arith.constant 0 : index
    %8 = vector.load %arg4[%c0_6, %c0_7] : memref<128x128xf32, #tpu.memory_space<vmem>>, vector<128x128xf32>
    %cst_8 = arith.constant dense<0.000000e+00> : vector<256x128xf32>
    %9 = tpu.matmul %7, %8, %cst_8 {dimension_numbers = #tpu.dot_dimension_numbers<[1], [0], [0], [1], [0, 0, 1, 1], [], []>} : vector<256x128xf32>, vector<128x128xf32>, vector<256x128xf32> -> vector<256x128xf32>
    %10 = arith.truncf %9 : vector<256x128xf32> to vector<256x128xbf16>
    %cst_9 = arith.constant dense<0.000000e+00> : vector<256x128xf32>
    %11 = tpu.matmul %0, %10, %cst_9 {dimension_numbers = #tpu.dot_dimension_numbers<[1], [0], [0], [1], [0, 0, 1, 1], [], []>} : vector<256x256xbf16>, vector<256x128xbf16>, vector<256x128xf32> -> vector<256x128xf32>
    %c0_10 = arith.constant 0 : index
    %c0_11 = arith.constant 0 : index
    %12 = vector.load %arg5[%c0_10, %c0_11] : memref<1x128xf32, #tpu.memory_space<vmem>>, vector<1x128xf32>
    %13 = vector.broadcast %12 : vector<1x128xf32> to vector<256x128xf32>
    %14 = arith.addf %11, %13 : vector<256x128xf32>
    %c0_12 = arith.constant 0 : index
    %c0_13 = arith.constant 0 : index
    %15 = vector.load %arg6[%c0_12, %c0_13] : memref<256x128xf32, #tpu.memory_space<vmem>>, vector<256x128xf32>
    tpu.vector_store %arg6[%c0_12, %c0_13], %14 {strides = array<i32>} : memref<256x128xf32, #tpu.memory_space<vmem>>, vector<256x128xf32>,
    return
  }
  func.func @transform_0(%arg0: i32) -> (i32, i32) {
    %c0_i32 = arith.constant 0 : i32
    %c0_i32_0 = arith.constant 0 : i32
    %c0_i32_1 = arith.constant 0 : i32
    return %c0_i32, %c0_i32_0 : i32, i32
  }
  func.func @transform_1(%arg0: i32) -> (i32, i32) {
    %c0_i32 = arith.constant 0 : i32
    %c0_i32_0 = arith.constant 0 : i32
    %c0_i32_1 = arith.constant 0 : i32
    return %c0_i32, %c0_i32_0 : i32, i32
  }
  func.func @transform_2(%arg0: i32) -> (i32, i32) {
    %c0_i32 = arith.constant 0 : i32
    %c0_i32_0 = arith.constant 0 : i32
    %c0_i32_1 = arith.constant 0 : i32
    return %c0_i32, %c0_i32_0 : i32, i32
  }
  func.func @transform_3(%arg0: i32) -> (i32, i32) {
    %c0_i32 = arith.constant 0 : i32
    %c0_i32_0 = arith.constant 0 : i32
    %c0_i32_1 = arith.constant 0 : i32
    return %c0_i32, %c0_i32_0 : i32, i32
  }
  func.func @transform_4(%arg0: i32) -> (i32, i32) {
    %c0_i32 = arith.constant 0 : i32
    %c0_i32_0 = arith.constant 0 : i32
    %c0_i32_1 = arith.constant 0 : i32
    return %c0_i32, %c0_i32_0 : i32, i32
  }
  func.func @transform_5(%arg0: i32) -> (i32, i32) {
    %c0_i32 = arith.constant 0 : i32
    %c0_i32_0 = arith.constant 0 : i32
    %c0_i32_1 = arith.constant 0 : i32
    return %c0_i32, %c0_i32_0 : i32, i32
  }
}

</mosaic_0001>

<bundles_post_ra>
// kernel: tpu_custom_call.1
= control target key start
LH: loop header
LB: loop body
LE: loop exit
PB: predicated region body
PF: predicated region fallthrough
CT: control target
= control target key end

     0   :  { %10 = vsyncpa [#allocation3], 0  ;;  %s1914_s0 = inlined_call_operand.hbm [shape: bf16[256,256], index: 0, kind: input, shape index: {}]   ;;  %s1915_s1 = inlined_call_operand.hbm [shape: bf16[256,128], index: 1, kind: input, shape index: {}]   ;;  %s1916_s2 = inlined_call_operand.vmem [shape: f32[1,128], index: 2, kind: input, shape index: {}]   ;;  %s1917_s3 = inlined_call_operand.hbm [shape: f32[128,128], index: 3, kind: input, shape index: {}]   ;;  %s1918_s4 = inlined_call_operand.vmem [shape: f32[1,128], index: 4, kind: input, shape index: {}]   ;;  %s1919_s5 = inlined_call_operand.hbm [shape: f32[256,128], index: 5, kind: output, shape index: {}]  }
   0x1   :  { %11 = vsyncpa [#allocation6], 0 }
   0x2   :  { %12 = vsyncpa [#allocation4], 0  ;;  %s1650_s18 = smov [#allocation5]  }
   0x3   :  { %s30_s19 = sshll.u32 %s1650_s18, 4  ;;  %s31_s19 = int_to_ptr.vmem [resolvable:$true] %s30_s19 }
   0x4   :  { %s1572_s20 = scalar_lea.vmem %s31_s19, 2048  ;;  %p1577_p1 = scmp.lt.s32.totalorder %s31_s19, %s31_s19 }
   0x5   :  { %p1573_p0 = scmp.ne.s32.totalorder %s31_s19, %s1572_s20  ;;  %p1578_p2 = scmp.lt.s32.totalorder %s1572_s20, %s1572_s20 }
   0x7   :  { %p1579_p3 = por %p1578_p2, %p1577_p1 }
   0x9   :  { %p1580_p4 = pnand %p1579_p3, %p1573_p0 }
   0xb   :  { %1583 = shalt.err (!%p1580_p4)
}
   0xc   :  { %s1651_s21 = smov 64   ;;  %s1652_s22 = smov 4  }
   0xd   :  { %36 = dma.hbm_to_vmem [thread:$0]  %s1915_s1, 2048, %s31_s19, [#allocation6], %s1651_s21, %s1651_s21, %s1652_s22  }
   0xe   :  { %s1653_s25 = smov [#allocation2]  }
   0xf   :  { %s18_s26 = sshll.u32 %s1653_s25, 4  ;;  %s19_s26 = int_to_ptr.vmem [resolvable:$true] %s18_s26 }
  0x10   :  { %s1592_s27 = scalar_lea.vmem %s19_s26, 4096  ;;  %p1597_p6 = scmp.lt.s32.totalorder %s19_s26, %s19_s26 }
  0x11   :  { %p1593_p5 = scmp.ne.s32.totalorder %s19_s26, %s1592_s27  ;;  %p1598_p7 = scmp.lt.s32.totalorder %s1592_s27, %s1592_s27 }
  0x13   :  { %p1599_p8 = por %p1598_p7, %p1597_p6 }
  0x15   :  { %p1600_p9 = pnand %p1599_p8, %p1593_p5 }
  0x17   :  { %1603 = shalt.err (!%p1600_p9)
}
  0x18   :  { %s1654_s28 = smov 128   ;;  %s1655_s29 = smov 8  }
  0x19   :  { %24 = dma.hbm_to_vmem [thread:$0]  %s1914_s0, 4096, %s19_s26, [#allocation3], %s1654_s28, %s1654_s28, %s1655_s29  }
  0x1a   :  { %s1656_s1 = smov [#allocation7]  }
  0x1b   :  { %s44_s7 = sshll.u32 %s1656_s1, 4  ;;  %s45_s7 = int_to_ptr.vmem [resolvable:$true] %s44_s7 }
  0x1c   :  { %s1612_s8 = scalar_lea.vmem %s45_s7, 2048  ;;  %p1617_p11 = scmp.lt.s32.totalorder %s45_s7, %s45_s7 }
  0x1d   :  { %p1613_p10 = scmp.ne.s32.totalorder %s45_s7, %s1612_s8  ;;  %p1618_p12 = scmp.lt.s32.totalorder %s1612_s8, %s1612_s8 }
  0x1f   :  { %p1619_p13 = por %p1618_p12, %p1617_p11 }
  0x21   :  { %p1620_p0 = pnand %p1619_p13, %p1613_p10 }
  0x23   :  { %1623 = shalt.err (!%p1620_p0)
}
  0x24   :  { %50 = dma.hbm_to_vmem [thread:$0]  %s1917_s3, 2048, %s45_s7, [#allocation6], %s1654_s28, %s1654_s28, %s1655_s29  }
  0x25   :  { %1644 = dma.done.wait [#allocation3], 4096  }
  0x26   :  { %1645 = vsyncadd [#allocation3], 4294963200 }
  0x27   :  { %1646 = dma.done.wait [#allocation6], 4096  }
  0x28   :  { %1647 = vsyncadd [#allocation6], 4294963200  ;;  %v1500_v0 = vld [vmem:[#allocation5 + $0x78] sm:$0xff]   ;;  %v1502_v2 = vld [vmem:[#allocation5 + $0x70] sm:$0xff]  }
  0x29   :  { %v1501_v1 = vld [vmem:[#allocation5 + $0x38] sm:$0xff]   ;;  %1108 = vmatprep.subr.bf16.mxu0 %v1500_v0  ;;  %v1503_v3 = vld [vmem:[#allocation5 + $0x30] sm:$0xff]   ;;  %v1504_v4 = vld [vmem:[#allocation5 + $0x68] sm:$0xff]  }
  0x2a   :  { %1109 = vmatpush3.bf16.msra.mxu0 %v1501_v1  ;;  %v1505_v5 = vld [vmem:[#allocation5 + $0x28] sm:$0xff]   ;;  %v1506_v6 = vld [vmem:[#allocation5 + $0x60] sm:$0xff]   ;;  %v1508_v8 = vld [vmem:[#allocation5 + $0x58] sm:$0xff]  }
  0x2b   :  { %1110 = vmatprep.subr.bf16.mxu0 %v1502_v2  ;;  %v1507_v7 = vld [vmem:[#allocation5 + $0x20] sm:$0xff]   ;;  %v1509_v9 = vld [vmem:[#allocation5 + $0x18] sm:$0xff]   ;;  %v1510_v10 = vld [vmem:[#allocation5 + $0x50] sm:$0xff]  }
  0x2c   :  { %v1703_v11 = vld [vmem:[#allocation2 + $0x4] ss:$8 sps:$4 sm:$0xff]   ;;  %v1511_v12 = vld [vmem:[#allocation5 + $0x10] sm:$0xff]   ;;  %v1706_v17 = vld [vmem:[#allocation2] ss:$8 sps:$4 sm:$0xff]  }
  0x2d   :  { %422 = vmatprep.mubr.bf16.mxu0 %v1703_v11  ;;  %v1512_v13 = vld [vmem:[#allocation5 + $0x48] sm:$0xff]   ;;  %v1514_v15 = vld [vmem:[#allocation5 + $0x40] sm:$0xff]   ;;  %v1708_v18 = vld [vmem:[#allocation2 + $0x14] ss:$8 sps:$4 sm:$0xff]  }
  0x2e   :  { %1111 = vmatpush3.bf16.msra.mxu0 %v1503_v3  ;;  %v1513_v14 = vld [vmem:[#allocation5 + $0x8] sm:$0xff]   ;;  %v1515_v16 = vld [vmem:[#allocation5] sm:$0xff]   ;;  %v598_v19 = vld [vmem:[#allocation7 + $0x78] sm:$0xff] }
  0x2f   :  { %1112 = vmatprep.subr.bf16.mxu0 %v1504_v4  ;;  %v597_v20 = vld [vmem:[#allocation7 + $0x70] sm:$0xff]  ;;  %1460 = vmatprep.subr.mxu1 %v598_v19  ;;  %v1714_v22 = vld [vmem:[#allocation2 + $0x24] ss:$8 sps:$4 sm:$0xff]   ;;  %v594_v25 = vld [vmem:[#allocation7 + $0x58] sm:$0xff] }
  0x30   :  { %v1712_v21 = vld [vmem:[#allocation2 + $0x10] ss:$8 sps:$4 sm:$0xff]   ;;  %v596_v23 = vld [vmem:[#allocation7 + $0x68] sm:$0xff]  ;;  %1476 = vmatpush3.msra.mxu1 %v598_v19  ;;  %v595_v24 = vld [vmem:[#allocation7 + $0x60] sm:$0xff] }
  0x31   :  { %1461 = vmatprep.subr.mxu1 %v597_v20  ;;  %v593_v26 = vld [vmem:[#allocation7 + $0x50] sm:$0xff]  ;;  %v1718_v27 = vld [vmem:[#allocation2 + $0x20] ss:$8 sps:$4 sm:$0xff]   ;;  %v590_v31 = vld [vmem:[#allocation7 + $0x38] sm:$0xff] }
  0x32   :  { %1113 = vmatpush3.bf16.msra.mxu0 %v1505_v5  ;;  %1477 = vmatpush3.msra.mxu1 %v597_v20  ;;  %v1720_v28 = vld [vmem:[#allocation2 + $0x34] ss:$8 sps:$4 sm:$0xff]   ;;  %v592_v29 = vld [vmem:[#allocation7 + $0x48] sm:$0xff]  ;;  %v591_v30 = vld [vmem:[#allocation7 + $0x40] sm:$0xff] }
  0x33   :  { %1114 = vmatprep.subr.bf16.mxu0 %v1506_v6  ;;  %1462 = vmatprep.subr.mxu1 %v596_v23  ;;  %v589_v32 = vld [vmem:[#allocation7 + $0x30] sm:$0xff]  ;;  %v1726_v34 = vld [vmem:[#allocation2 + $0x44] ss:$8 sps:$4 sm:$0xff]   ;;  %v1730_v35 = vld [vmem:[#allocation2 + $0x40] ss:$8 sps:$4 sm:$0xff]  }
  0x34   :  { %1478 = vmatpush3.msra.mxu1 %v596_v23  ;;  %v1724_v33 = vld [vmem:[#allocation2 + $0x30] ss:$8 sps:$4 sm:$0xff]   ;;  %v1732_v36 = vld [vmem:[#allocation2 + $0x54] ss:$8 sps:$4 sm:$0xff]   ;;  %v1738_v38 = vld [vmem:[#allocation2 + $0x64] ss:$8 sps:$4 sm:$0xff]  }
  0x35   :  { %1463 = vmatprep.subr.mxu1 %v595_v24  ;;  %v1736_v37 = vld [vmem:[#allocation2 + $0x50] ss:$8 sps:$4 sm:$0xff]   ;;  %v1742_v39 = vld [vmem:[#allocation2 + $0x60] ss:$8 sps:$4 sm:$0xff]   ;;  %v1744_v40 = vld [vmem:[#allocation2 + $0x74] ss:$8 sps:$4 sm:$0xff]  }
  0x36   :  { %1115 = vmatpush3.bf16.msra.mxu0 %v1507_v7  ;;  %1479 = vmatpush3.msra.mxu1 %v595_v24  ;;  %v1748_v41 = vld [vmem:[#allocation2 + $0x70] ss:$8 sps:$4 sm:$0xff]   ;;  %v1750_v42 = vld [vmem:[#allocation2 + $0x84] ss:$8 sps:$4 sm:$0xff]   ;;  %v1754_v43 = vld [vmem:[#allocation2 + $0x80] ss:$8 sps:$4 sm:$0xff]  }
  0x37   :  { %1116 = vmatprep.subr.bf16.mxu0 %v1508_v8  ;;  %1464 = vmatprep.subr.mxu1 %v594_v25  ;;  %v1756_v44 = vld [vmem:[#allocation2 + $0x94] ss:$8 sps:$4 sm:$0xff]   ;;  %v588_v45 = vld [vmem:[#allocation7 + $0x28] sm:$0xff]  ;;  %v587_v46 = vld [vmem:[#allocation7 + $0x20] sm:$0xff] }
  0x38   :  { %1480 = vmatpush3.msra.mxu1 %v594_v25  ;;  %v1760_v47 = vld [vmem:[#allocation2 + $0x90] ss:$8 sps:$4 sm:$0xff]   ;;  %v1762_v49 = vld [vmem:[#allocation2 + $0xa4] ss:$8 sps:$4 sm:$0xff]   ;;  %v1766_v53 = vld [vmem:[#allocation2 + $0xa0] ss:$8 sps:$4 sm:$0xff]  }
  0x39   :  { %1465 = vmatprep.subr.mxu1 %v593_v26  ;;  %v586_v48 = vld [vmem:[#allocation7 + $0x18] sm:$0xff]  ;;  %v585_v50 = vld [vmem:[#allocation7 + $0x10] sm:$0xff]  ;;  %v584_v51 = vld [vmem:[#allocation7 + $0x8] sm:$0xff] }
  0x3a   :  { %1117 = vmatpush3.bf16.msra.mxu0 %v1509_v9  ;;  %1481 = vmatpush3.msra.mxu1 %v593_v26  ;;  %v583_v52 = vld [vmem:[#allocation7] sm:$0xff]  ;;  %v1768_v54 = vld [vmem:[#allocation2 + $0xb4] ss:$8 sps:$4 sm:$0xff]   ;;  %v1772_v55 = vld [vmem:[#allocation2 + $0xb0] ss:$8 sps:$4 sm:$0xff]  }
  0x3b   :  { %1118 = vmatprep.subr.bf16.mxu0 %v1510_v10  ;;  %1466 = vmatprep.subr.mxu1 %v592_v29  ;;  %1930 = vst [vmem:[#allocation12_spill] sm:$0xff] %v1768_v54  ;;  %1931 = vst [vmem:[#allocation13_spill] sm:$0xff] %v1772_v55  ;;  %v1774_v56 = vld [vmem:[#allocation2 + $0xc4] ss:$8 sps:$4 sm:$0xff]   ;;  %v1778_v57 = vld [vmem:[#allocation2 + $0xc0] ss:$8 sps:$4 sm:$0xff]  }
  0x3c   :  { %1482 = vmatpush3.msra.mxu1 %v592_v29  ;;  %1932 = vst [vmem:[#allocation14_spill] sm:$0xff] %v1774_v56  ;;  %1933 = vst [vmem:[#allocation15_spill] sm:$0xff] %v1778_v57  ;;  %v1780_v58 = vld [vmem:[#allocation2 + $0xd4] ss:$8 sps:$4 sm:$0xff]   ;;  %v1784_v59 = vld [vmem:[#allocation2 + $0xd0] ss:$8 sps:$4 sm:$0xff]  }
  0x3d   :  { %1467 = vmatprep.subr.mxu1 %v591_v30  ;;  %1934 = vst [vmem:[#allocation16_spill] sm:$0xff] %v1780_v58  ;;  %1935 = vst [vmem:[#allocation17_spill] sm:$0xff] %v1784_v59  ;;  %v1786_v60 = vld [vmem:[#allocation2 + $0xe4] ss:$8 sps:$4 sm:$0xff]   ;;  %v1790_v61 = vld [vmem:[#allocation2 + $0xe0] ss:$8 sps:$4 sm:$0xff]  }
  0x3e   :  { %1119 = vmatpush3.bf16.msra.mxu0 %v1511_v12  ;;  %1483 = vmatpush3.msra.mxu1 %v591_v30  ;;  %1936 = vst [vmem:[#allocation18_spill] sm:$0xff] %v1786_v60  ;;  %1937 = vst [vmem:[#allocation19_spill] sm:$0xff] %v1790_v61  ;;  %v1792_v62 = vld [vmem:[#allocation2 + $0xf4] ss:$8 sps:$4 sm:$0xff]   ;;  %v1796_v63 = vld [vmem:[#allocation2 + $0xf0] ss:$8 sps:$4 sm:$0xff]  }
  0x3f   :  { %1120 = vmatprep.subr.bf16.mxu0 %v1512_v13  ;;  %1468 = vmatprep.subr.mxu1 %v590_v31  ;;  %1938 = vst [vmem:[#allocation20_spill] sm:$0xff] %v1792_v62  ;;  %1939 = vst [vmem:[#allocation21_spill] sm:$0xff] %v1796_v63  ;;  %v1802_v1 = vld [vmem:[%s1916_s2] ss:$0 sm:$0xff] }
  0x40   :  { %1484 = vmatpush3.msra.mxu1 %v590_v31 }
  0x41   :  { %1469 = vmatprep.subr.mxu1 %v589_v32 }
  0x42   :  { %1121 = vmatpush3.bf16.msra.mxu0 %v1513_v14  ;;  %1485 = vmatpush3.msra.mxu1 %v589_v32 }
  0x43   :  { %1122 = vmatprep.subr.bf16.mxu0 %v1514_v15  ;;  %1470 = vmatprep.subr.mxu1 %v588_v45 }
  0x44   :  { %1486 = vmatpush3.msra.mxu1 %v588_v45 }
  0x45   :  { %1471 = vmatprep.subr.mxu1 %v587_v46 }
  0x46   :  { %1123 = vmatpush3.bf16.msra.mxu0 %v1515_v16  ;;  %1487 = vmatpush3.msra.mxu1 %v587_v46 }
  0x47   :  { %1380 = vmatprep.subr.mxu0 %v598_v19  ;;  %1472 = vmatprep.subr.mxu1 %v586_v48 }
  0x48   :  { %1488 = vmatpush3.msra.mxu1 %v586_v48 }
  0x49   :  { %423 = vmatmul.mubr.bf16.vlgmr.msra.gmra.mxu0 %v1706_v17  ;;  %1473 = vmatprep.subr.mxu1 %v585_v50 }
  0x4a   :  { %430 = vmatprep.mubr.bf16.mxu0 %v1708_v18  ;;  %1381 = vmatpush3.msra.mxu0 %v598_v19 }
  0x4b   :  { %1382 = vmatprep.subr.mxu0 %v597_v20  ;;  %1489 = vmatpush3.msra.mxu1 %v585_v50 }
  0x4c   :  { %1383 = vmatpush3.msra.mxu0 %v597_v20  ;;  %1474 = vmatprep.subr.mxu1 %v584_v51 }
  0x4d   :  { %1384 = vmatprep.subr.mxu0 %v596_v23  ;;  %1490 = vmatpush3.msra.mxu1 %v584_v51 }
  0x4e   :  { %1385 = vmatpush3.msra.mxu0 %v596_v23  ;;  %1475 = vmatprep.subr.mxu1 %v583_v52 }
  0x4f   :  { %1386 = vmatprep.subr.mxu0 %v595_v24  ;;  %1491 = vmatpush3.msra.mxu1 %v583_v52 }
  0x50   :  { %1387 = vmatpush3.msra.mxu0 %v595_v24 }
  0x51   :  { %431 = vmatmul.mubr.bf16.gmra.mxu0 %v1712_v21  ;;  %1388 = vmatprep.subr.mxu0 %v594_v25 }
  0x52   :  { %438 = vmatprep.mubr.bf16.mxu0 %v1714_v22  ;;  %1389 = vmatpush3.msra.mxu0 %v594_v25 }
  0x53   :  { %1390 = vmatprep.subr.mxu0 %v593_v26 }
  0x54   :  { %1391 = vmatpush3.msra.mxu0 %v593_v26 }
  0x55   :  { %1392 = vmatprep.subr.mxu0 %v592_v29 }
  0x56   :  { %1393 = vmatpush3.msra.mxu0 %v592_v29 }
  0x57   :  { %1394 = vmatprep.subr.mxu0 %v591_v30 }
  0x58   :  { %1395 = vmatpush3.msra.mxu0 %v591_v30 }
  0x59   :  { %439 = vmatmul.mubr.bf16.gmra.mxu0 %v1718_v27  ;;  %1396 = vmatprep.subr.mxu0 %v590_v31 }
  0x5a   :  { %446 = vmatprep.mubr.bf16.mxu0 %v1720_v28  ;;  %1397 = vmatpush3.msra.mxu0 %v590_v31 }
  0x5b   :  { %1398 = vmatprep.subr.mxu0 %v589_v32 }
  0x5c   :  { %1399 = vmatpush3.msra.mxu0 %v589_v32 }
  0x5d   :  { %1400 = vmatprep.subr.mxu0 %v588_v45 }
  0x5e   :  { %1401 = vmatpush3.msra.mxu0 %v588_v45 }
  0x5f   :  { %1402 = vmatprep.subr.mxu0 %v587_v46 }
  0x60   :  { %1403 = vmatpush3.msra.mxu0 %v587_v46 }
  0x61   :  { %447 = vmatmul.mubr.bf16.gmra.mxu0 %v1724_v33  ;;  %1404 = vmatprep.subr.mxu0 %v586_v48 }
  0x62   :  { %454 = vmatprep.mubr.bf16.mxu0 %v1726_v34  ;;  %1405 = vmatpush3.msra.mxu0 %v586_v48 }
  0x63   :  { %1406 = vmatprep.subr.mxu0 %v585_v50 }
  0x64   :  { %1407 = vmatpush3.msra.mxu0 %v585_v50 }
  0x65   :  { %1408 = vmatprep.subr.mxu0 %v584_v51 }
  0x66   :  { %1409 = vmatpush3.msra.mxu0 %v584_v51 }
  0x67   :  { %1410 = vmatprep.subr.mxu0 %v583_v52 }
  0x68   :  { %1411 = vmatpush3.msra.mxu0 %v583_v52 }
  0x69   :  { %455 = vmatmul.mubr.bf16.gmra.mxu0 %v1730_v35 }
  0x6a   :  { %462 = vmatprep.mubr.bf16.mxu0 %v1732_v36 }
  0x71   :  { %463 = vmatmul.mubr.bf16.gmra.mxu0 %v1736_v37 }
  0x72   :  { %470 = vmatprep.mubr.bf16.mxu0 %v1738_v38 }
  0x79   :  { %471 = vmatmul.mubr.bf16.gmra.mxu0 %v1742_v39 }
  0x7a   :  { %478 = vmatprep.mubr.bf16.mxu0 %v1744_v40 }
  0x81   :  { %479 = vmatmul.mubr.bf16.gmra.mxu0 %v1748_v41 }
  0x82   :  { %486 = vmatprep.mubr.bf16.mxu0 %v1750_v42 }
  0x89   :  { %487 = vmatmul.mubr.bf16.gmra.mxu0 %v1754_v43 }
  0x8a   :  { %494 = vmatprep.mubr.bf16.mxu0 %v1756_v44 }
  0x91   :  { %495 = vmatmul.mubr.bf16.gmra.mxu0 %v1760_v47 }
  0x92   :  { %502 = vmatprep.mubr.bf16.mxu0 %v1762_v49 }
  0x99   :  { %503 = vmatmul.mubr.bf16.gmra.mxu0 %v1766_v53 }
  0x9a   :  { %510 = vmatprep.mubr.bf16.mxu0 %v1768_v54 }
  0xa1   :  { %511 = vmatmul.mubr.bf16.gmra.mxu0 %v1772_v55 }
  0xa2   :  { %518 = vmatprep.mubr.bf16.mxu0 %v1774_v56 }
  0xa9   :  { %519 = vmatmul.mubr.bf16.gmra.mxu0 %v1778_v57 }
  0xaa   :  { %526 = vmatprep.mubr.bf16.mxu0 %v1780_v58 }
  0xb1   :  { %527 = vmatmul.mubr.bf16.gmra.mxu0 %v1784_v59 }
  0xb2   :  { %534 = vmatprep.mubr.bf16.mxu0 %v1786_v60 }
  0xb9   :  { %535 = vmatmul.mubr.bf16.gmra.mxu0 %v1790_v61 }
  0xba   :  { %542 = vmatprep.mubr.bf16.mxu0 %v1792_v62 }
  0xc1   :  { %543 = vmatmul.mubr.bf16.gmra.mxu0 %v1796_v63 }
 0x109   :  { %v1124_v0 = vpop.f32.mrf.mxu0 }
 0x10b   :  { %v1125_v2 = vpop.f32.mrf.mxu0 }
 0x10c   :  { %v1126_v3 = vadd.f32 %v1125_v2, %v1124_v0 }
 0x10d   :  { %v1127_v4 = vpop.f32.mrf.mxu0 }
 0x10e   :  { %v425_v5 = vadd.f32 %v1126_v3, %v1802_v1 }
 0x10f   :  { %v1128_v6 = vpop.f32.mrf.mxu0 }
 0x110   :  { %v551_v7 = vmax.f32 %v425_v5, 0.0  ;;  %v1129_v8 = vadd.f32 %v1128_v6, %v1127_v4 }
 0x111   :  { %v1130_v9 = vpop.f32.mrf.mxu0 }
 0x112   :  { %v428_v10 = vadd.f32 %v1129_v8, %v1802_v1  ;;  %1412 = vmatprep.mubr.f32.mxu0 %v551_v7 }
 0x113   :  { %v1131_v12 = vpop.f32.mrf.mxu0 }
 0x114   :  { %v552_v13 = vmax.f32 %v428_v10, 0.0  ;;  %v1132_v14 = vadd.f32 %v1131_v12, %v1130_v9 }
 0x115   :  { %v1133_v15 = vpop.f32.mrf.mxu0 }
 0x116   :  { %v433_v16 = vadd.f32 %v1132_v14, %v1802_v1  ;;  %1413 = vmatmul.mubr.f32.vlgmr.msra.gmra.mxu0 %v552_v13 }
 0x117   :  { %v1134_v19 = vpop.f32.mrf.mxu0 }
 0x118   :  { %v553_v20 = vmax.f32 %v433_v16, 0.0  ;;  %v1135_v23 = vadd.f32 %v1134_v19, %v1133_v15 }
 0x119   :  { %v1136_v24 = vpop.f32.mrf.mxu0 }
 0x11a   :  { %v436_v25 = vadd.f32 %v1135_v23, %v1802_v1  ;;  %1415 = vmatprep.mubr.f32.mxu0 %v553_v20 }
 0x11b   :  { %v1137_v26 = vpop.f32.mrf.mxu0 }
 0x11c   :  { %v554_v29 = vmax.f32 %v436_v25, 0.0  ;;  %v1138_v30 = vadd.f32 %v1137_v26, %v1136_v24 }
 0x11d   :  { %v1139_v31 = vpop.f32.mrf.mxu0 }
 0x11e   :  { %v441_v32 = vadd.f32 %v1138_v30, %v1802_v1  ;;  %1416 = vmatmul.mubr.f32.gmra.mxu0 %v554_v29 }
 0x11f   :  { %v1140_v45 = vpop.f32.mrf.mxu0 }
 0x120   :  { %v555_v46 = vmax.f32 %v441_v32, 0.0  ;;  %v1141_v48 = vadd.f32 %v1140_v45, %v1139_v31 }
 0x121   :  { %v1142_v50 = vpop.f32.mrf.mxu0 }
 0x122   :  { %v444_v51 = vadd.f32 %v1141_v48, %v1802_v1  ;;  %1418 = vmatprep.mubr.f32.mxu0 %v555_v46 }
 0x123   :  { %v1143_v52 = vpop.f32.mrf.mxu0 }
 0x124   :  { %v556_v0 = vmax.f32 %v444_v51, 0.0  ;;  %v1144_v2 = vadd.f32 %v1143_v52, %v1142_v50 }
 0x125   :  { %v1145_v3 = vpop.f32.mrf.mxu0 }
 0x126   :  { %v449_v4 = vadd.f32 %v1144_v2, %v1802_v1  ;;  %1419 = vmatmul.mubr.f32.gmra.mxu0 %v556_v0 }
 0x127   :  { %v1146_v5 = vpop.f32.mrf.mxu0 }
 0x128   :  { %v557_v6 = vmax.f32 %v449_v4, 0.0  ;;  %v1147_v7 = vadd.f32 %v1146_v5, %v1145_v3 }
 0x129   :  { %v1148_v8 = vpop.f32.mrf.mxu0 }
 0x12a   :  { %v452_v9 = vadd.f32 %v1147_v7, %v1802_v1  ;;  %1421 = vmatprep.mubr.f32.mxu0 %v557_v6 }
 0x12b   :  { %v1149_v10 = vpop.f32.mrf.mxu0 }
 0x12c   :  { %v558_v12 = vmax.f32 %v452_v9, 0.0  ;;  %v1150_v13 = vadd.f32 %v1149_v10, %v1148_v8 }
 0x12d   :  { %v1151_v14 = vpop.f32.mrf.mxu0 }
 0x12e   :  { %v457_v15 = vadd.f32 %v1150_v13, %v1802_v1  ;;  %1422 = vmatmul.mubr.f32.gmra.mxu0 %v558_v12 }
 0x12f   :  { %v1152_v16 = vpop.f32.mrf.mxu0 }
 0x130   :  { %v559_v19 = vmax.f32 %v457_v15, 0.0  ;;  %v1153_v20 = vadd.f32 %v1152_v16, %v1151_v14 }
 0x131   :  { %v1154_v23 = vpop.f32.mrf.mxu0 }
 0x132   :  { %v460_v24 = vadd.f32 %v1153_v20, %v1802_v1  ;;  %1424 = vmatprep.mubr.f32.mxu0 %v559_v19 }
 0x133   :  { %v1155_v25 = vpop.f32.mrf.mxu0 }
 0x134   :  { %v560_v26 = vmax.f32 %v460_v24, 0.0  ;;  %v1156_v29 = vadd.f32 %v1155_v25, %v1154_v23 }
 0x135   :  { %v1157_v30 = vpop.f32.mrf.mxu0 }
 0x136   :  { %v465_v31 = vadd.f32 %v1156_v29, %v1802_v1  ;;  %1425 = vmatmul.mubr.f32.gmra.mxu0 %v560_v26 }
 0x137   :  { %v1158_v32 = vpop.f32.mrf.mxu0 }
 0x138   :  { %v561_v45 = vmax.f32 %v465_v31, 0.0  ;;  %v1159_v46 = vadd.f32 %v1158_v32, %v1157_v30 }
 0x139   :  { %v1160_v48 = vpop.f32.mrf.mxu0 }
 0x13a   :  { %v468_v50 = vadd.f32 %v1159_v46, %v1802_v1  ;;  %1427 = vmatprep.mubr.f32.mxu0 %v561_v45 }
 0x13b   :  { %v1161_v51 = vpop.f32.mrf.mxu0 }
 0x13c   :  { %v562_v52 = vmax.f32 %v468_v50, 0.0  ;;  %v1162_v0 = vadd.f32 %v1161_v51, %v1160_v48 }
 0x13d   :  { %v1163_v2 = vpop.f32.mrf.mxu0 }
 0x13e   :  { %v473_v3 = vadd.f32 %v1162_v0, %v1802_v1  ;;  %1428 = vmatmul.mubr.f32.gmra.mxu0 %v562_v52 }
 0x13f   :  { %v1164_v4 = vpop.f32.mrf.mxu0 }
 0x140   :  { %v563_v5 = vmax.f32 %v473_v3, 0.0  ;;  %v1165_v6 = vadd.f32 %v1164_v4, %v1163_v2 }
 0x141   :  { %v1166_v7 = vpop.f32.mrf.mxu0 }
 0x142   :  { %v476_v8 = vadd.f32 %v1165_v6, %v1802_v1  ;;  %1430 = vmatprep.mubr.f32.mxu0 %v563_v5 }
 0x143   :  { %v1167_v9 = vpop.f32.mrf.mxu0 }
 0x144   :  { %v564_v10 = vmax.f32 %v476_v8, 0.0  ;;  %v1168_v12 = vadd.f32 %v1167_v9, %v1166_v7 }
 0x145   :  { %v1169_v13 = vpop.f32.mrf.mxu0 }
 0x146   :  { %v481_v14 = vadd.f32 %v1168_v12, %v1802_v1  ;;  %1431 = vmatmul.mubr.f32.gmra.mxu0 %v564_v10 }
 0x147   :  { %v1170_v15 = vpop.f32.mrf.mxu0 }
 0x148   :  { %v565_v16 = vmax.f32 %v481_v14, 0.0  ;;  %v1171_v19 = vadd.f32 %v1170_v15, %v1169_v13 }
 0x149   :  { %v1172_v20 = vpop.f32.mrf.mxu0 }
 0x14a   :  { %v484_v23 = vadd.f32 %v1171_v19, %v1802_v1  ;;  %1433 = vmatprep.mubr.f32.mxu0 %v565_v16 }
 0x14b   :  { %v1173_v24 = vpop.f32.mrf.mxu0 }
 0x14c   :  { %v566_v25 = vmax.f32 %v484_v23, 0.0  ;;  %v1174_v26 = vadd.f32 %v1173_v24, %v1172_v20 }
 0x14d   :  { %v1175_v29 = vpop.f32.mrf.mxu0 }
 0x14e   :  { %1434 = vmatmul.mubr.f32.gmra.mxu0 %v566_v25  ;;  %v489_v30 = vadd.f32 %v1174_v26, %v1802_v1 }
 0x14f   :  { %v1176_v31 = vpop.f32.mrf.mxu0 }
 0x150   :  { %v1177_v32 = vadd.f32 %v1176_v31, %v1175_v29  ;;  %v567_v45 = vmax.f32 %v489_v30, 0.0 }
 0x151   :  { %v1178_v46 = vpop.f32.mrf.mxu0 }
 0x152   :  { %v492_v48 = vadd.f32 %v1177_v32, %v1802_v1  ;;  %1436 = vmatprep.mubr.f32.mxu1 %v567_v45 }
 0x153   :  { %v1179_v50 = vpop.f32.mrf.mxu0 }
 0x154   :  { %v568_v51 = vmax.f32 %v492_v48, 0.0  ;;  %v1180_v52 = vadd.f32 %v1179_v50, %v1178_v46 }
 0x155   :  { %v1181_v0 = vpop.f32.mrf.mxu0 }
 0x156   :  { %v497_v2 = vadd.f32 %v1180_v52, %v1802_v1  ;;  %1437 = vmatmul.mubr.f32.vlgmr.msra.gmra.mxu1 %v568_v51 }
 0x157   :  { %v1182_v3 = vpop.f32.mrf.mxu0 }
 0x158   :  { %v569_v4 = vmax.f32 %v497_v2, 0.0  ;;  %v1183_v5 = vadd.f32 %v1182_v3, %v1181_v0 }
 0x159   :  { %v1184_v6 = vpop.f32.mrf.mxu0 }
 0x15a   :  { %v500_v7 = vadd.f32 %v1183_v5, %v1802_v1  ;;  %1439 = vmatprep.mubr.f32.mxu1 %v569_v4 }
 0x15b   :  { %v1185_v8 = vpop.f32.mrf.mxu0 }
 0x15c   :  { %v570_v9 = vmax.f32 %v500_v7, 0.0  ;;  %v1186_v10 = vadd.f32 %v1185_v8, %v1184_v6 }
 0x15d   :  { %v1187_v12 = vpop.f32.mrf.mxu0 }
 0x15e   :  { %v505_v13 = vadd.f32 %v1186_v10, %v1802_v1  ;;  %1440 = vmatmul.mubr.f32.gmra.mxu1 %v570_v9 }
 0x15f   :  { %v1188_v14 = vpop.f32.mrf.mxu0 }
 0x160   :  { %v571_v15 = vmax.f32 %v505_v13, 0.0  ;;  %v1189_v16 = vadd.f32 %v1188_v14, %v1187_v12 }
 0x161   :  { %v1190_v19 = vpop.f32.mrf.mxu0 }
 0x162   :  { %v508_v20 = vadd.f32 %v1189_v16, %v1802_v1  ;;  %1442 = vmatprep.mubr.f32.mxu1 %v571_v15 }
 0x163   :  { %v1191_v23 = vpop.f32.mrf.mxu0 }
 0x164   :  { %v572_v24 = vmax.f32 %v508_v20, 0.0  ;;  %v1192_v25 = vadd.f32 %v1191_v23, %v1190_v19 }
 0x165   :  { %v1193_v26 = vpop.f32.mrf.mxu0 }
 0x166   :  { %v513_v29 = vadd.f32 %v1192_v25, %v1802_v1  ;;  %1443 = vmatmul.mubr.f32.gmra.mxu1 %v572_v24 }
 0x167   :  { %v1194_v30 = vpop.f32.mrf.mxu0 }
 0x168   :  { %v573_v31 = vmax.f32 %v513_v29, 0.0  ;;  %v1195_v32 = vadd.f32 %v1194_v30, %v1193_v26 }
 0x169   :  { %v1196_v45 = vpop.f32.mrf.mxu0 }
 0x16a   :  { %v516_v46 = vadd.f32 %v1195_v32, %v1802_v1  ;;  %1445 = vmatprep.mubr.f32.mxu1 %v573_v31 }
 0x16b   :  { %v1197_v48 = vpop.f32.mrf.mxu0 }
 0x16c   :  { %v574_v50 = vmax.f32 %v516_v46, 0.0  ;;  %v1198_v51 = vadd.f32 %v1197_v48, %v1196_v45 }
 0x16d   :  { %v1199_v52 = vpop.f32.mrf.mxu0 }
 0x16e   :  { %v521_v0 = vadd.f32 %v1198_v51, %v1802_v1  ;;  %1446 = vmatmul.mubr.f32.gmra.mxu1 %v574_v50 }
 0x16f   :  { %v1200_v2 = vpop.f32.mrf.mxu0 }
 0x170   :  { %v575_v3 = vmax.f32 %v521_v0, 0.0  ;;  %v1201_v4 = vadd.f32 %v1200_v2, %v1199_v52 }
 0x171   :  { %v1202_v5 = vpop.f32.mrf.mxu0 }
 0x172   :  { %v524_v6 = vadd.f32 %v1201_v4, %v1802_v1  ;;  %1448 = vmatprep.mubr.f32.mxu1 %v575_v3 }
 0x173   :  { %v1203_v7 = vpop.f32.mrf.mxu0 }
 0x174   :  { %v576_v8 = vmax.f32 %v524_v6, 0.0  ;;  %v1204_v9 = vadd.f32 %v1203_v7, %v1202_v5 }
 0x175   :  { %v1205_v10 = vpop.f32.mrf.mxu0 }
 0x176   :  { %v529_v12 = vadd.f32 %v1204_v9, %v1802_v1  ;;  %1449 = vmatmul.mubr.f32.gmra.mxu1 %v576_v8 }
 0x177   :  { %v1206_v13 = vpop.f32.mrf.mxu0 }
 0x178   :  { %v577_v14 = vmax.f32 %v529_v12, 0.0  ;;  %v1207_v15 = vadd.f32 %v1206_v13, %v1205_v10 }
 0x179   :  { %v1208_v16 = vpop.f32.mrf.mxu0 }
 0x17a   :  { %v532_v19 = vadd.f32 %v1207_v15, %v1802_v1  ;;  %1451 = vmatprep.mubr.f32.mxu1 %v577_v14 }
 0x17b   :  { %v1209_v20 = vpop.f32.mrf.mxu0 }
 0x17c   :  { %v578_v23 = vmax.f32 %v532_v19, 0.0  ;;  %v1210_v24 = vadd.f32 %v1209_v20, %v1208_v16 }
 0x17d   :  { %v1211_v25 = vpop.f32.mrf.mxu0 }
 0x17e   :  { %v537_v26 = vadd.f32 %v1210_v24, %v1802_v1  ;;  %1452 = vmatmul.mubr.f32.gmra.mxu1 %v578_v23 }
 0x17f   :  { %v1212_v29 = vpop.f32.mrf.mxu0 }
 0x180   :  { %v579_v30 = vmax.f32 %v537_v26, 0.0  ;;  %v1213_v31 = vadd.f32 %v1212_v29, %v1211_v25 }
 0x181   :  { %v1214_v32 = vpop.f32.mrf.mxu0 }
 0x182   :  { %v540_v45 = vadd.f32 %v1213_v31, %v1802_v1  ;;  %1454 = vmatprep.mubr.f32.mxu1 %v579_v30 }
 0x183   :  { %v1215_v46 = vpop.f32.mrf.mxu0 }
 0x184   :  { %v580_v48 = vmax.f32 %v540_v45, 0.0  ;;  %v1216_v50 = vadd.f32 %v1215_v46, %v1214_v32 }
 0x185   :  { %v1217_v51 = vpop.f32.mrf.mxu0 }
 0x186   :  { %v545_v52 = vadd.f32 %v1216_v50, %v1802_v1  ;;  %1455 = vmatmul.mubr.f32.gmra.mxu1 %v580_v48 }
 0x187   :  { %v1218_v0 = vpop.f32.mrf.mxu0 }
 0x188   :  { %v581_v2 = vmax.f32 %v545_v52, 0.0  ;;  %v1219_v3 = vadd.f32 %v1218_v0, %v1217_v51 }
 0x18a   :  { %v548_v4 = vadd.f32 %v1219_v3, %v1802_v1  ;;  %1457 = vmatprep.mubr.f32.mxu1 %v581_v2 }
 0x18c   :  { %v582_v5 = vmax.f32 %v548_v4, 0.0 }
 0x18e   :  { %1458 = vmatmul.mubr.f32.gmra.mxu1 %v582_v5 }
 0x18f   :  { %879 = vmatprep.mubr.bf16.mxu1 %v1703_v11 }
 0x1d6   :  { %v1837_v6 = vpop.f32.mrf.mxu0 }
 0x1d8   :  { %v665_v8 = vpop.f32.mrf.mxu0 }
 0x1de   :  { %v1417_v9 = vpop.f32.mrf.mxu0 }
 0x1e0   :  { %v675_v13 = vpop.f32.mrf.mxu0 }
 0x1e6   :  { %v1420_v14 = vpop.f32.mrf.mxu0 }
 0x1e8   :  { %v685_v19 = vpop.f32.mrf.mxu0 }
 0x1ee   :  { %v1423_v20 = vpop.f32.mrf.mxu0 }
 0x1f0   :  { %v695_v24 = vpop.f32.mrf.mxu0 }
 0x1f1   :  { %v827_v55 = vpack.c.bf16 %v1423_v20, %v695_v24 }
 0x1f6   :  { %v1426_v25 = vpop.f32.mrf.mxu0 }
 0x1f8   :  { %v705_v11 = vpop.f32.mrf.mxu0 }
 0x1f9   :  { %v828_v57 = vpack.c.bf16 %v1426_v25, %v705_v11 }
 0x1fe   :  { %v1429_v30 = vpop.f32.mrf.mxu0 }
 0x200   :  { %v715_v45 = vpop.f32.mrf.mxu0 }
 0x201   :  { %v829_v59 = vpack.c.bf16 %v1429_v30, %v715_v45 }
 0x206   :  { %v1432_v46 = vpop.f32.mrf.mxu0 }
 0x208   :  { %v725_v51 = vpop.f32.mrf.mxu0 }
 0x209   :  { %v830_v61 = vpack.c.bf16 %v1432_v46, %v725_v51 }
 0x20e   :  { %v1435_v52 = vpop.f32.mrf.mxu0 }
 0x210   :  { %v735_v3 = vpop.f32.mrf.mxu0 }
 0x211   :  { %v831_v63 = vpack.c.bf16 %v1435_v52, %v735_v3 }
 0x216   :  { %v1438_v7 = vpop.f32.mrf.mxu1 }
 0x218   :  { %v745_v10 = vpop.f32.mrf.mxu1 }
 0x21e   :  { %v1441_v12 = vpop.f32.mrf.mxu1 }
 0x220   :  { %v755_v15 = vpop.f32.mrf.mxu1 }
 0x221   :  { %v833_v52 = vpack.c.bf16 %v1441_v12, %v755_v15 }
 0x226   :  { %v1444_v16 = vpop.f32.mrf.mxu1 }
 0x228   :  { %v765_v23 = vpop.f32.mrf.mxu1 }
 0x229   :  { %v834_v54 = vpack.c.bf16 %v1444_v16, %v765_v23 }
 0x22e   :  { %v1447_v1 = vpop.f32.mrf.mxu1 }
 0x230   :  { %v775_v26 = vpop.f32.mrf.mxu1 }
 0x231   :  { %v835_v56 = vpack.c.bf16 %v1447_v1, %v775_v26 }
 0x236   :  { %v1450_v29 = vpop.f32.mrf.mxu1 }
 0x238   :  { %v785_v31 = vpop.f32.mrf.mxu1 }
 0x239   :  { %v836_v58 = vpack.c.bf16 %v1450_v29, %v785_v31 }
 0x23e   :  { %v1453_v32 = vpop.f32.mrf.mxu1 }
 0x240   :  { %v795_v48 = vpop.f32.mrf.mxu1 }
 0x241   :  { %v837_v60 = vpack.c.bf16 %v1453_v32, %v795_v48 }
 0x246   :  { %v1456_v50 = vpop.f32.mrf.mxu1 }
 0x248   :  { %v805_v0 = vpop.f32.mrf.mxu1 }
 0x249   :  { %v838_v62 = vpack.c.bf16 %v1456_v50, %v805_v0  ;;  %v826_v50 = vpack.c.bf16 %v1420_v14, %v685_v19 }
 0x24e   :  { %v1459_v2 = vpop.f32.mrf.mxu1 }
 0x250   :  { %v815_v4 = vpop.f32.mrf.mxu1 }
 0x251   :  { %v839_v5 = vpack.c.bf16 %v1459_v2, %v815_v4 }
 0x253   :  { %1268 = vmatprep.subr.bf16.mxu1 %v839_v5 }
 0x254   :  { %1269 = vmatpush3.bf16.msra.mxu1 %v831_v63  ;;  %v832_v63 = vpack.c.bf16 %v1438_v7, %v745_v10 }
 0x255   :  { %1270 = vmatprep.subr.bf16.mxu1 %v838_v62  ;;  %v825_v62 = vpack.c.bf16 %v1417_v9, %v675_v13 }
 0x258   :  { %1271 = vmatpush3.bf16.msra.mxu1 %v830_v61 }
 0x259   :  { %1272 = vmatprep.subr.bf16.mxu1 %v837_v60  ;;  %v824_v60 = vpack.c.bf16 %v1837_v6, %v665_v8 }
 0x25c   :  { %1273 = vmatpush3.bf16.msra.mxu1 %v829_v59 }
 0x25d   :  { %1274 = vmatprep.subr.bf16.mxu1 %v836_v58 }
 0x260   :  { %1275 = vmatpush3.bf16.msra.mxu1 %v828_v57 }
 0x261   :  { %1276 = vmatprep.subr.bf16.mxu1 %v835_v56 }
 0x264   :  { %1277 = vmatpush3.bf16.msra.mxu1 %v827_v55 }
 0x265   :  { %1278 = vmatprep.subr.bf16.mxu1 %v834_v54 }
 0x268   :  { %1279 = vmatpush3.bf16.msra.mxu1 %v826_v50 }
 0x269   :  { %1280 = vmatprep.subr.bf16.mxu1 %v833_v52 }
 0x26c   :  { %1281 = vmatpush3.bf16.msra.mxu1 %v825_v62 }
 0x26d   :  { %1282 = vmatprep.subr.bf16.mxu1 %v832_v63 }
 0x270   :  { %1283 = vmatpush3.bf16.msra.mxu1 %v824_v60 }
 0x273   :  { %880 = vmatmul.mubr.bf16.vlgmr.msra.gmra.mxu1 %v1706_v17  ;;  %v1940_v17 = vld [vmem:[#allocation12_spill] sm:$0xff] }
 0x274   :  { %887 = vmatprep.mubr.bf16.mxu1 %v1708_v18  ;;  %v1941_v18 = vld [vmem:[#allocation13_spill] sm:$0xff] }
 0x27b   :  { %888 = vmatmul.mubr.bf16.gmra.mxu1 %v1712_v21  ;;  %v1942_v21 = vld [vmem:[#allocation14_spill] sm:$0xff] }
 0x27c   :  { %895 = vmatprep.mubr.bf16.mxu1 %v1714_v22  ;;  %v1943_v22 = vld [vmem:[#allocation15_spill] sm:$0xff] }
 0x283   :  { %896 = vmatmul.mubr.bf16.gmra.mxu1 %v1718_v27  ;;  %v1944_v27 = vld [vmem:[#allocation16_spill] sm:$0xff] }
 0x284   :  { %903 = vmatprep.mubr.bf16.mxu1 %v1720_v28  ;;  %v1945_v28 = vld [vmem:[#allocation17_spill] sm:$0xff] }
 0x28b   :  { %904 = vmatmul.mubr.bf16.gmra.mxu1 %v1724_v33  ;;  %v1946_v33 = vld [vmem:[#allocation18_spill] sm:$0xff] }
 0x28c   :  { %911 = vmatprep.mubr.bf16.mxu1 %v1726_v34  ;;  %v1947_v34 = vld [vmem:[#allocation19_spill] sm:$0xff] }
 0x293   :  { %912 = vmatmul.mubr.bf16.gmra.mxu1 %v1730_v35  ;;  %v1948_v35 = vld [vmem:[#allocation20_spill] sm:$0xff] }
 0x294   :  { %919 = vmatprep.mubr.bf16.mxu1 %v1732_v36  ;;  %v1949_v36 = vld [vmem:[#allocation21_spill] sm:$0xff] }
 0x29b   :  { %920 = vmatmul.mubr.bf16.gmra.mxu1 %v1736_v37 }
 0x29c   :  { %927 = vmatprep.mubr.bf16.mxu1 %v1738_v38  ;;  %v1874_v38 = vld [vmem:[%s1918_s4] ss:$0 sm:$0xff]  ;;  %s1657_s4 = smov [#allocation8]  }
 0x29d   :  { %s1045_s12 = sshll.u32 %s1657_s4, 4  ;;  %s1046_s12 = int_to_ptr.vmem [resolvable:$true] %s1045_s12 }
 0x29e   :  { %s1624_s13 = scalar_lea.vmem %s1046_s12, 4096  ;;  %p1629_p2 = scmp.lt.s32.totalorder %s1046_s12, %s1046_s12 }
 0x29f   :  { %p1625_p1 = scmp.ne.s32.totalorder %s1046_s12, %s1624_s13  ;;  %p1630_p3 = scmp.lt.s32.totalorder %s1624_s13, %s1624_s13 }
 0x2a1   :  { %p1631_p4 = por %p1630_p3, %p1629_p2 }
 0x2a3   :  { %928 = vmatmul.mubr.bf16.gmra.mxu1 %v1742_v39  ;;  %p1632_p5 = pnand %p1631_p4, %p1625_p1 }
 0x2a4   :  { %935 = vmatprep.mubr.bf16.mxu1 %v1744_v40 }
 0x2ab   :  { %936 = vmatmul.mubr.bf16.gmra.mxu1 %v1748_v41 }
 0x2ac   :  { %943 = vmatprep.mubr.bf16.mxu1 %v1750_v42 }
 0x2b3   :  { %944 = vmatmul.mubr.bf16.gmra.mxu1 %v1754_v43 }
 0x2b4   :  { %951 = vmatprep.mubr.bf16.mxu1 %v1756_v44 }
 0x2bb   :  { %952 = vmatmul.mubr.bf16.gmra.mxu1 %v1760_v47 }
 0x2bc   :  { %959 = vmatprep.mubr.bf16.mxu1 %v1762_v49 }
 0x2c3   :  { %960 = vmatmul.mubr.bf16.gmra.mxu1 %v1766_v53 }
 0x2c4   :  { %967 = vmatprep.mubr.bf16.mxu1 %v1940_v17 }
 0x2cb   :  { %968 = vmatmul.mubr.bf16.gmra.mxu1 %v1941_v18 }
 0x2cc   :  { %975 = vmatprep.mubr.bf16.mxu1 %v1942_v21 }
 0x2d3   :  { %976 = vmatmul.mubr.bf16.gmra.mxu1 %v1943_v22 }
 0x2d4   :  { %983 = vmatprep.mubr.bf16.mxu1 %v1944_v27 }
 0x2db   :  { %984 = vmatmul.mubr.bf16.gmra.mxu1 %v1945_v28 }
 0x2dc   :  { %991 = vmatprep.mubr.bf16.mxu1 %v1946_v33 }
 0x2e3   :  { %992 = vmatmul.mubr.bf16.gmra.mxu1 %v1947_v34 }
 0x2e4   :  { %999 = vmatprep.mubr.bf16.mxu1 %v1948_v35 }
 0x2eb   :  { %1000 = vmatmul.mubr.bf16.gmra.mxu1 %v1949_v36 }
 0x333   :  { %v1284_v37 = vpop.f32.mrf.mxu1 }
 0x335   :  { %v1285_v39 = vpop.f32.mrf.mxu1 }
 0x336   :  { %v1286_v40 = vadd.f32 %v1285_v39, %v1284_v37 }
 0x337   :  { %v1287_v41 = vpop.f32.mrf.mxu1 }
 0x338   :  { %v882_v42 = vadd.f32 %v1286_v40, %v1874_v38 }
 0x339   :  { %v1288_v43 = vpop.f32.mrf.mxu1 }
 0x33a   :  { %1008 = vst [vmem:[#allocation8] sm:$0xff] %v882_v42  ;;  %v1289_v44 = vadd.f32 %v1288_v43, %v1287_v41 }
 0x33b   :  { %v1290_v47 = vpop.f32.mrf.mxu1 }
 0x33c   :  { %v885_v49 = vadd.f32 %v1289_v44, %v1874_v38 }
 0x33d   :  { %v1291_v53 = vpop.f32.mrf.mxu1 }
 0x33e   :  { %1009 = vst [vmem:[#allocation8 + $0x8] sm:$0xff] %v885_v49  ;;  %v1292_v54 = vadd.f32 %v1291_v53, %v1290_v47 }
 0x33f   :  { %v1293_v55 = vpop.f32.mrf.mxu1 }
 0x340   :  { %v890_v56 = vadd.f32 %v1292_v54, %v1874_v38 }
 0x341   :  { %v1294_v57 = vpop.f32.mrf.mxu1 }
 0x342   :  { %1010 = vst [vmem:[#allocation8 + $0x10] sm:$0xff] %v890_v56  ;;  %v1295_v58 = vadd.f32 %v1294_v57, %v1293_v55 }
 0x343   :  { %v1296_v59 = vpop.f32.mrf.mxu1 }
 0x344   :  { %v893_v61 = vadd.f32 %v1295_v58, %v1874_v38 }
 0x345   :  { %v1297_v6 = vpop.f32.mrf.mxu1 }
 0x346   :  { %1011 = vst [vmem:[#allocation8 + $0x18] sm:$0xff] %v893_v61  ;;  %v1298_v7 = vadd.f32 %v1297_v6, %v1296_v59 }
 0x347   :  { %v1299_v8 = vpop.f32.mrf.mxu1 }
 0x348   :  { %v898_v9 = vadd.f32 %v1298_v7, %v1874_v38 }
 0x349   :  { %v1300_v10 = vpop.f32.mrf.mxu1 }
 0x34a   :  { %1012 = vst [vmem:[#allocation8 + $0x20] sm:$0xff] %v898_v9  ;;  %v1301_v12 = vadd.f32 %v1300_v10, %v1299_v8 }
 0x34b   :  { %v1302_v13 = vpop.f32.mrf.mxu1 }
 0x34c   :  { %v901_v14 = vadd.f32 %v1301_v12, %v1874_v38 }
 0x34d   :  { %v1303_v15 = vpop.f32.mrf.mxu1 }
 0x34e   :  { %1013 = vst [vmem:[#allocation8 + $0x28] sm:$0xff] %v901_v14  ;;  %v1304_v16 = vadd.f32 %v1303_v15, %v1302_v13 }
 0x34f   :  { %v1305_v19 = vpop.f32.mrf.mxu1 }
 0x350   :  { %v906_v20 = vadd.f32 %v1304_v16, %v1874_v38 }
 0x351   :  { %v1306_v23 = vpop.f32.mrf.mxu1 }
 0x352   :  { %1014 = vst [vmem:[#allocation8 + $0x30] sm:$0xff] %v906_v20  ;;  %v1307_v1 = vadd.f32 %v1306_v23, %v1305_v19 }
 0x353   :  { %v1308_v24 = vpop.f32.mrf.mxu1 }
 0x354   :  { %v909_v25 = vadd.f32 %v1307_v1, %v1874_v38 }
 0x355   :  { %v1309_v26 = vpop.f32.mrf.mxu1 }
 0x356   :  { %1015 = vst [vmem:[#allocation8 + $0x38] sm:$0xff] %v909_v25  ;;  %v1310_v29 = vadd.f32 %v1309_v26, %v1308_v24 }
 0x357   :  { %v1311_v11 = vpop.f32.mrf.mxu1 }
 0x358   :  { %v914_v30 = vadd.f32 %v1310_v29, %v1874_v38 }
 0x359   :  { %v1312_v31 = vpop.f32.mrf.mxu1 }
 0x35a   :  { %1016 = vst [vmem:[#allocation8 + $0x40] sm:$0xff] %v914_v30  ;;  %v1313_v32 = vadd.f32 %v1312_v31, %v1311_v11 }
 0x35b   :  { %v1314_v45 = vpop.f32.mrf.mxu1 }
 0x35c   :  { %v917_v46 = vadd.f32 %v1313_v32, %v1874_v38 }
 0x35d   :  { %v1315_v48 = vpop.f32.mrf.mxu1 }
 0x35e   :  { %1017 = vst [vmem:[#allocation8 + $0x48] sm:$0xff] %v917_v46  ;;  %v1316_v51 = vadd.f32 %v1315_v48, %v1314_v45 }
 0x35f   :  { %v1317_v0 = vpop.f32.mrf.mxu1 }
 0x360   :  { %v922_v2 = vadd.f32 %v1316_v51, %v1874_v38 }
 0x361   :  { %v1318_v3 = vpop.f32.mrf.mxu1 }
 0x362   :  { %1018 = vst [vmem:[#allocation8 + $0x50] sm:$0xff] %v922_v2  ;;  %v1319_v4 = vadd.f32 %v1318_v3, %v1317_v0 }
 0x363   :  { %v1320_v5 = vpop.f32.mrf.mxu1 }
 0x364   :  { %v925_v50 = vadd.f32 %v1319_v4, %v1874_v38 }
 0x365   :  { %v1321_v52 = vpop.f32.mrf.mxu1 }
 0x366   :  { %1019 = vst [vmem:[#allocation8 + $0x58] sm:$0xff] %v925_v50  ;;  %v1322_v62 = vadd.f32 %v1321_v52, %v1320_v5 }
 0x367   :  { %v1323_v63 = vpop.f32.mrf.mxu1 }
 0x368   :  { %v930_v60 = vadd.f32 %v1322_v62, %v1874_v38 }
 0x369   :  { %v1324_v17 = vpop.f32.mrf.mxu1 }
 0x36a   :  { %1020 = vst [vmem:[#allocation8 + $0x60] sm:$0xff] %v930_v60  ;;  %v1325_v18 = vadd.f32 %v1324_v17, %v1323_v63 }
 0x36b   :  { %v1326_v21 = vpop.f32.mrf.mxu1 }
 0x36c   :  { %v933_v22 = vadd.f32 %v1325_v18, %v1874_v38 }
 0x36d   :  { %v1327_v27 = vpop.f32.mrf.mxu1 }
 0x36e   :  { %1021 = vst [vmem:[#allocation8 + $0x68] sm:$0xff] %v933_v22  ;;  %v1328_v28 = vadd.f32 %v1327_v27, %v1326_v21 }
 0x36f   :  { %v1329_v33 = vpop.f32.mrf.mxu1 }
 0x370   :  { %v938_v34 = vadd.f32 %v1328_v28, %v1874_v38 }
 0x371   :  { %v1330_v35 = vpop.f32.mrf.mxu1 }
 0x372   :  { %1022 = vst [vmem:[#allocation8 + $0x70] sm:$0xff] %v938_v34  ;;  %v1331_v36 = vadd.f32 %v1330_v35, %v1329_v33 }
 0x373   :  { %v1332_v37 = vpop.f32.mrf.mxu1 }
 0x374   :  { %v941_v39 = vadd.f32 %v1331_v36, %v1874_v38 }
 0x375   :  { %v1333_v40 = vpop.f32.mrf.mxu1 }
 0x376   :  { %1023 = vst [vmem:[#allocation8 + $0x78] sm:$0xff] %v941_v39  ;;  %v1334_v41 = vadd.f32 %v1333_v40, %v1332_v37 }
 0x377   :  { %v1335_v42 = vpop.f32.mrf.mxu1 }
 0x378   :  { %v946_v43 = vadd.f32 %v1334_v41, %v1874_v38 }
 0x379   :  { %v1336_v44 = vpop.f32.mrf.mxu1 }
 0x37a   :  { %1024 = vst [vmem:[#allocation8 + $0x80] sm:$0xff] %v946_v43  ;;  %v1337_v47 = vadd.f32 %v1336_v44, %v1335_v42 }
 0x37b   :  { %v1338_v49 = vpop.f32.mrf.mxu1 }
 0x37c   :  { %v949_v53 = vadd.f32 %v1337_v47, %v1874_v38 }
 0x37d   :  { %v1339_v54 = vpop.f32.mrf.mxu1 }
 0x37e   :  { %1025 = vst [vmem:[#allocation8 + $0x88] sm:$0xff] %v949_v53  ;;  %v1340_v55 = vadd.f32 %v1339_v54, %v1338_v49 }
 0x37f   :  { %v1341_v56 = vpop.f32.mrf.mxu1 }
 0x380   :  { %v954_v57 = vadd.f32 %v1340_v55, %v1874_v38 }
 0x381   :  { %v1342_v58 = vpop.f32.mrf.mxu1 }
 0x382   :  { %1026 = vst [vmem:[#allocation8 + $0x90] sm:$0xff] %v954_v57  ;;  %v1343_v59 = vadd.f32 %v1342_v58, %v1341_v56 }
 0x383   :  { %v1344_v61 = vpop.f32.mrf.mxu1 }
 0x384   :  { %v957_v6 = vadd.f32 %v1343_v59, %v1874_v38 }
 0x385   :  { %v1345_v7 = vpop.f32.mrf.mxu1 }
 0x386   :  { %1027 = vst [vmem:[#allocation8 + $0x98] sm:$0xff] %v957_v6  ;;  %v1346_v8 = vadd.f32 %v1345_v7, %v1344_v61 }
 0x387   :  { %v1347_v9 = vpop.f32.mrf.mxu1 }
 0x388   :  { %v962_v10 = vadd.f32 %v1346_v8, %v1874_v38 }
 0x389   :  { %v1348_v12 = vpop.f32.mrf.mxu1 }
 0x38a   :  { %1028 = vst [vmem:[#allocation8 + $0xa0] sm:$0xff] %v962_v10  ;;  %v1349_v13 = vadd.f32 %v1348_v12, %v1347_v9 }
 0x38b   :  { %v1350_v14 = vpop.f32.mrf.mxu1 }
 0x38c   :  { %v965_v15 = vadd.f32 %v1349_v13, %v1874_v38 }
 0x38d   :  { %v1351_v16 = vpop.f32.mrf.mxu1 }
 0x38e   :  { %1029 = vst [vmem:[#allocation8 + $0xa8] sm:$0xff] %v965_v15  ;;  %v1352_v19 = vadd.f32 %v1351_v16, %v1350_v14 }
 0x38f   :  { %v1353_v20 = vpop.f32.mrf.mxu1 }
 0x390   :  { %v970_v23 = vadd.f32 %v1352_v19, %v1874_v38 }
 0x391   :  { %v1354_v1 = vpop.f32.mrf.mxu1 }
 0x392   :  { %1030 = vst [vmem:[#allocation8 + $0xb0] sm:$0xff] %v970_v23  ;;  %v1355_v24 = vadd.f32 %v1354_v1, %v1353_v20 }
 0x393   :  { %v1356_v25 = vpop.f32.mrf.mxu1 }
 0x394   :  { %v973_v26 = vadd.f32 %v1355_v24, %v1874_v38 }
 0x395   :  { %v1357_v29 = vpop.f32.mrf.mxu1 }
 0x396   :  { %1031 = vst [vmem:[#allocation8 + $0xb8] sm:$0xff] %v973_v26  ;;  %v1358_v11 = vadd.f32 %v1357_v29, %v1356_v25 }
 0x397   :  { %v1359_v30 = vpop.f32.mrf.mxu1 }
 0x398   :  { %v978_v31 = vadd.f32 %v1358_v11, %v1874_v38 }
 0x399   :  { %v1360_v32 = vpop.f32.mrf.mxu1 }
 0x39a   :  { %1032 = vst [vmem:[#allocation8 + $0xc0] sm:$0xff] %v978_v31  ;;  %v1361_v45 = vadd.f32 %v1360_v32, %v1359_v30 }
 0x39b   :  { %v1362_v46 = vpop.f32.mrf.mxu1 }
 0x39c   :  { %v981_v48 = vadd.f32 %v1361_v45, %v1874_v38 }
 0x39d   :  { %v1363_v51 = vpop.f32.mrf.mxu1 }
 0x39e   :  { %1033 = vst [vmem:[#allocation8 + $0xc8] sm:$0xff] %v981_v48  ;;  %v1364_v0 = vadd.f32 %v1363_v51, %v1362_v46 }
 0x39f   :  { %v1365_v2 = vpop.f32.mrf.mxu1 }
 0x3a0   :  { %v986_v3 = vadd.f32 %v1364_v0, %v1874_v38 }
 0x3a1   :  { %v1366_v4 = vpop.f32.mrf.mxu1 }
 0x3a2   :  { %1034 = vst [vmem:[#allocation8 + $0xd0] sm:$0xff] %v986_v3  ;;  %v1367_v5 = vadd.f32 %v1366_v4, %v1365_v2 }
 0x3a3   :  { %v1368_v50 = vpop.f32.mrf.mxu1 }
 0x3a4   :  { %v989_v52 = vadd.f32 %v1367_v5, %v1874_v38 }
 0x3a5   :  { %v1369_v62 = vpop.f32.mrf.mxu1 }
 0x3a6   :  { %1035 = vst [vmem:[#allocation8 + $0xd8] sm:$0xff] %v989_v52  ;;  %v1370_v63 = vadd.f32 %v1369_v62, %v1368_v50 }
 0x3a7   :  { %v1371_v60 = vpop.f32.mrf.mxu1 }
 0x3a8   :  { %v994_v17 = vadd.f32 %v1370_v63, %v1874_v38 }
 0x3a9   :  { %v1372_v18 = vpop.f32.mrf.mxu1 }
 0x3aa   :  { %1036 = vst [vmem:[#allocation8 + $0xe0] sm:$0xff] %v994_v17  ;;  %v1373_v21 = vadd.f32 %v1372_v18, %v1371_v60 }
 0x3ab   :  { %v1374_v22 = vpop.f32.mrf.mxu1 }
 0x3ac   :  { %v997_v27 = vadd.f32 %v1373_v21, %v1874_v38 }
 0x3ad   :  { %v1375_v28 = vpop.f32.mrf.mxu1 }
 0x3ae   :  { %1037 = vst [vmem:[#allocation8 + $0xe8] sm:$0xff] %v997_v27  ;;  %v1376_v33 = vadd.f32 %v1375_v28, %v1374_v22 }
 0x3af   :  { %v1377_v34 = vpop.f32.mrf.mxu1 }
 0x3b0   :  { %v1002_v35 = vadd.f32 %v1376_v33, %v1874_v38 }
 0x3b1   :  { %v1378_v36 = vpop.f32.mrf.mxu1 }
 0x3b2   :  { %1038 = vst [vmem:[#allocation8 + $0xf0] sm:$0xff] %v1002_v35  ;;  %v1379_v37 = vadd.f32 %v1378_v36, %v1377_v34 }
 0x3b4   :  { %v1005_v39 = vadd.f32 %v1379_v37, %v1874_v38 }
 0x3b6   :  { %1039 = vst [vmem:[#allocation8 + $0xf8] sm:$0xff] %v1005_v39 }
 0x3b7   :  { %1635 = shalt.err (!%p1632_p5)
}
 0x3b8   :  { %1051 = dma.vmem_to_hbm [thread:$0]  %s1046_s12, 4096, %s1919_s5, [#allocation4], %s1654_s28, %s1654_s28, %s1655_s29  }
 0x3b9   :  { %1648 = dma.done.wait [#allocation4], 4096  }
 0x3ba   :  { %1649 = vsyncadd [#allocation4], 4294963200 }
 0x3bb   :  { %1055 = vsyncpa [#allocation3], 1 }
 0x3bc   :  { %1056 = vsyncpa [#allocation6], 1 }
 0x3bd   :  { %1057 = vsyncpa [#allocation4], 1 }

</bundles_post_ra>
